<compile_context>
chip_gen: v5e
topology: v5e:2x2
jax: 0.10.0
libtpu: 0.0.40
codegen_flags: <defaults>
</compile_context>

<pallas_src>
import jax
import jax.numpy as jnp
from jax.experimental import pallas as pl
from jax.experimental.pallas import tpu as pltpu


def _project_latent_kernel(x_ref, w_ref, b_ref, o_ref):
    # x_ref: (G, tile)   packed (batch-group * channels) on sublanes, spatial on lanes
    # w_ref: (G, G)      block-diagonal fused channel-mix matrix (kron(I_g, w2@w1)), input dtype
    # b_ref: (G, 1)      g-tiled fused bias (w2@b1 + b2), f32
    y = jnp.dot(w_ref[...], x_ref[...], preferred_element_type=jnp.float32)
    o_ref[...] = (y + b_ref[...]).astype(o_ref.dtype)


def project_latent_pallas(latent_nchw, w1, b1, w2, b2, *, tile_hw=65536):
    """ProjectLatent (child=None) forward.

    latent_nchw: (B, C_in, H, W)
    w1: (C_mid, C_in)  b1: (C_mid,)   -- input_conv  weight/bias (1x1, squeezed)
    w2: (C_in, C_mid)  b2: (C_in,)    -- output_conv weight/bias (1x1, squeezed)
    Returns (B, C_in, H, W).
    """
    B, C_in, H, W = latent_nchw.shape
    HW = H * W
    dtype = latent_nchw.dtype

    # --- Fold the two affine 1x1 convs into one exact affine op (host-side,
    # tiny (C_in x C_mid) matrices). ---
    w_fused = (w2.astype(jnp.float32) @ w1.astype(jnp.float32))            # (C_in, C_in) f32
    b_fused = (w2.astype(jnp.float32) @ b1.astype(jnp.float32)
               + b2.astype(jnp.float32)).reshape(C_in, 1)                  # (C_in, 1)  f32

    # --- Pack batches onto the sublane axis so vreg/VMEM tiles are full. ---
    itemsize = jnp.dtype(dtype).itemsize
    sublanes = 8 if itemsize >= 4 else 16          # f32 -> 8, bf16/f16 -> 16
    g_max = max(1, sublanes // C_in)
    g = 1
    for cand in range(min(g_max, B), 0, -1):       # largest divisor of B <= g_max
        if B % cand == 0:
            g = cand
            break
    G = g * C_in

    # Block-diagonal fused weight + tiled bias for the packed layout.
    w_pack = jnp.kron(jnp.eye(g, dtype=jnp.float32), w_fused).astype(dtype)  # (G, G)
    b_pack = jnp.tile(b_fused, (g, 1))                                       # (G, 1) f32

    # Keep NCHW layout: (B, C_in, HW) -> (B//g, G, HW).  Contiguous reshape.
    x = latent_nchw.reshape(B // g, G, HW)

    # --- Lane tile: as large as possible (multiple of 128), capped by VMEM
    # budget via tile_hw; ragged spatial tail handled by Pallas masking, not
    # wrapper-side pad/slice. ---
    if tile_hw >= HW:
        tile = HW                                   # full dim -> no alignment needed
    else:
        tile = max(128, (tile_hw // 128) * 128)     # 128-multiple interior tiles

    grid = (B // g, pl.cdiv(HW, tile))

    out = pl.pallas_call(
        _project_latent_kernel,
        out_shape=jax.ShapeDtypeStruct((B // g, G, HW), dtype),
        grid_spec=pltpu.PrefetchScalarGridSpec(
            num_scalar_prefetch=0,
            grid=grid,
            in_specs=[
                # Batch-group dim squeezed out -> kernel sees (G, tile).
                pl.BlockSpec((None, G, tile), lambda b, j: (b, 0, j)),
                pl.BlockSpec((G, G), lambda b, j: (0, 0)),
                pl.BlockSpec((G, 1), lambda b, j: (0, 0)),
            ],
            out_specs=pl.BlockSpec((None, G, tile), lambda b, j: (b, 0, j)),
        ),
        compiler_params=pltpu.CompilerParams(
            # Output blocks are disjoint across both axes -> shard across
            # v7x's two TensorCores when the grid has >= 2 steps.
            dimension_semantics=("parallel", "parallel"),
        ),
    )(x, w_pack, b_pack)

    return out.reshape(B, C_in, H, W)


def _init_conv_params(key, out_ch, in_ch):
    """Deterministic init mimicking PyTorch Conv2d default (kaiming-uniform
    weight, uniform bias), kernel_size=1."""
    kw, kb = jax.random.split(key)
    fan_in = in_ch  # kernel_size = 1
    bound_w = (1.0 / fan_in) ** 0.5 * (3.0 ** 0.5)  # kaiming_uniform a=sqrt(5) bound
    bound_b = (1.0 / fan_in) ** 0.5
    w = jax.random.uniform(kw, (out_ch, in_ch), jnp.float32, -bound_w, bound_w)
    b = jax.random.uniform(kb, (out_ch,), jnp.float32, -bound_b, bound_b)
    return w, b


if __name__ == "__main__":
    key = jax.random.PRNGKey(0)
    k_x, k_c1, k_c2 = jax.random.split(key, 3)

    B, input_dim, H, W = 2, 4, 16, 16
    output_dim = 8

    latent = jax.random.normal(k_x, (B, input_dim, H, W), jnp.float32)
    w1, b1 = _init_conv_params(k_c1, output_dim, input_dim)   # input_conv
    w2, b2 = _init_conv_params(k_c2, input_dim, output_dim)   # output_conv

    out = project_latent_pallas(latent, w1, b1, w2, b2)
    out = jax.block_until_ready(out)

    # Reference check in plain JAX (1x1 convs as einsums over channels).
    h_ref = jnp.einsum("bchw,oc->bohw", latent, w1) + b1[None, :, None, None]
    y_ref = jnp.einsum("bchw,oc->bohw", h_ref, w2) + b2[None, :, None, None]
    assert out.shape == (B, input_dim, H, W)
    assert jnp.allclose(out, y_ref, atol=1e-4, rtol=1e-4)

    print("KERNEL_OK")
</pallas_src>

<mosaic_0001>
module attributes {stable_mosaic.version = 11 : i64} {
  func.func @_project_latent_kernel(%arg0: i32, %arg1: i32, %arg2: memref<1x8x256xf32, #tpu.memory_space<vmem>>, %arg3: memref<8x8xf32, #tpu.memory_space<vmem>>, %arg4: memref<8x1xf32, #tpu.memory_space<vmem>>, %arg5: memref<1x8x256xf32, #tpu.memory_space<vmem>>) attributes {dimension_semantics = [#tpu.dimension_semantics<parallel>, #tpu.dimension_semantics<parallel>], iteration_bounds = array<i64: 1, 1>, scalar_prefetch = 0 : i64, scratch_operands = 0 : i64, tpu.core_type = #tpu.core_type<tc>, window_params = [{transform_indices = @transform_0, window_bounds = array<i64: 1, 8, 256>}, {pipeline_mode = #tpu.pipeline_mode<synchronous>, transform_indices = @transform_1, window_bounds = array<i64: 8, 8>}, {pipeline_mode = #tpu.pipeline_mode<synchronous>, transform_indices = @transform_2, window_bounds = array<i64: 8, 1>}, {transform_indices = @transform_3, window_bounds = array<i64: 1, 8, 256>}]} {
    %c0 = arith.constant 0 : index
    %c0_0 = arith.constant 0 : index
    %0 = vector.load %arg3[%c0, %c0_0] : memref<8x8xf32, #tpu.memory_space<vmem>>, vector<8x8xf32>
    %c0_1 = arith.constant 0 : index
    %c0_2 = arith.constant 0 : index
    %c0_3 = arith.constant 0 : index
    %1 = vector.load %arg2[%c0_1, %c0_2, %c0_3] : memref<1x8x256xf32, #tpu.memory_space<vmem>>, vector<1x8x256xf32>
    %2 = vector.shape_cast %1 : vector<1x8x256xf32> to vector<8x256xf32>
    %cst = arith.constant dense<0.000000e+00> : vector<8x256xf32>
    %3 = tpu.matmul %0, %2, %cst {dimension_numbers = #tpu.dot_dimension_numbers<[1], [0], [0], [1], [0, 0, 1, 1], [], []>} : vector<8x8xf32>, vector<8x256xf32>, vector<8x256xf32> -> vector<8x256xf32>
    %c0_4 = arith.constant 0 : index
    %c0_5 = arith.constant 0 : index
    %4 = vector.load %arg4[%c0_4, %c0_5] : memref<8x1xf32, #tpu.memory_space<vmem>>, vector<8x1xf32>
    %5 = vector.broadcast %4 : vector<8x1xf32> to vector<8x256xf32>
    %6 = arith.addf %3, %5 : vector<8x256xf32>
    %c0_6 = arith.constant 0 : index
    %c0_7 = arith.constant 0 : index
    %c0_8 = arith.constant 0 : index
    %7 = vector.load %arg5[%c0_6, %c0_7, %c0_8] : memref<1x8x256xf32, #tpu.memory_space<vmem>>, vector<1x8x256xf32>
    %8 = vector.shape_cast %7 : vector<1x8x256xf32> to vector<8x256xf32>
    %9 = vector.shape_cast %6 : vector<8x256xf32> to vector<1x8x256xf32>
    tpu.vector_store %arg5[%c0_6, %c0_7, %c0_8], %9 {strides = array<i32>} : memref<1x8x256xf32, #tpu.memory_space<vmem>>, vector<1x8x256xf32>,
    return
  }
  func.func @transform_0(%arg0: i32, %arg1: i32) -> (i32, i32, i32) {
    %c0_i32 = arith.constant 0 : i32
    %c0_i32_0 = arith.constant 0 : i32
    return %arg0, %c0_i32, %arg1 : i32, i32, i32
  }
  func.func @transform_1(%arg0: i32, %arg1: i32) -> (i32, i32) {
    %c0_i32 = arith.constant 0 : i32
    %c0_i32_0 = arith.constant 0 : i32
    %c0_i32_1 = arith.constant 0 : i32
    return %c0_i32, %c0_i32_0 : i32, i32
  }
  func.func @transform_2(%arg0: i32, %arg1: i32) -> (i32, i32) {
    %c0_i32 = arith.constant 0 : i32
    %c0_i32_0 = arith.constant 0 : i32
    %c0_i32_1 = arith.constant 0 : i32
    return %c0_i32, %c0_i32_0 : i32, i32
  }
  func.func @transform_3(%arg0: i32, %arg1: i32) -> (i32, i32, i32) {
    %c0_i32 = arith.constant 0 : i32
    %c0_i32_0 = arith.constant 0 : i32
    return %arg0, %c0_i32, %arg1 : i32, i32, i32
  }
}

</mosaic_0001>

<bundles_post_ra>
// kernel: tpu_custom_call.1
= control target key start
LH: loop header
LB: loop body
LE: loop exit
PB: predicated region body
PF: predicated region fallthrough
CT: control target
= control target key end

     0   :  { %8 = vsyncpa [#allocation3], 0  ;;  %s194_s0 = inlined_call_operand.hbm [shape: f32[1,8,256], index: 0, kind: input, shape index: {}]   ;;  %s195_s1 = inlined_call_operand.vmem [shape: f32[8,8], index: 1, kind: input, shape index: {}]   ;;  %s196_s2 = inlined_call_operand.vmem [shape: f32[8,1], index: 2, kind: input, shape index: {}]   ;;  %s197_s3 = inlined_call_operand.hbm [shape: f32[1,8,256], index: 3, kind: output, shape index: {}]  }
   0x1   :  { %9 = vsyncpa [#allocation4], 0  ;;  %s15_s14 = sshll.u32 %s194_s0, 4  ;;  %s159_s15 = smov [#allocation2]   ;;  %s16_s14 = int_to_ptr.hbm [resolvable:$true] %s15_s14 }
   0x2   :  { %s17_s16 = sshll.u32 %s159_s15, 4  ;;  %s18_s16 = int_to_ptr.vmem [resolvable:$true] %s17_s16 }
   0x3   :  { %20 = dma.hbm_to_vmem [thread:$0]  %s16_s14, 256, %s18_s16, [#allocation3]  }
   0x4   :  { %155 = dma.done.wait [#allocation3], 256  }
   0x5   :  { %156 = vsyncadd [#allocation3], 4294967040  ;;  %v160_v0 = vmov 0   ;;  %vm38_vm0 = vcmask 64512   ;;  %v30_v1 = vld [vmem:[#allocation2] sm:$0xff]  ;;  %v31_v2 = vld [vmem:[#allocation2 + $0x8] sm:$0xff] }
   0x6   :  { %106 = vset.pattern.permute.xlu0 %v160_v0  ;;  %v29_v3 = vld [vmem:[%s195_s1] sm:$0xff]  ;;  %57 = vmatpush.msra.mxu0 %v30_v1  ;;  %s161_s20 = smov [#allocation5]   ;;  %s91_s24 = sshll.u32 %s197_s3, 4  ;;  %s92_s24 = int_to_ptr.hbm [resolvable:$true] %s91_s24 }
   0x7   :  { %77 = vmatpush.msra.mxu1 %v31_v2  ;;  %v32_v4 = vld [vmem:[%s196_s2] sm:$0xff]  ;;  %101 = vmatmul.msk.f32.vlgmr.msra.gmra.mxu0 %vm38_vm0, %v29_v3  ;;  %s89_s21 = sshll.u32 %s161_s20, 4  ;;  %s90_s21 = int_to_ptr.vmem [resolvable:$true] %s89_s21 }
   0x8   :  { %102 = vmatmul.msk.f32.vlgmr.msra.gmra.mxu1 %vm38_vm0, %v29_v3  ;;  %35 = vperm.xlu0 %106, %v32_v4  }
  0x7a   :  { %v36_v5 = vpop.permute.xlu0 %35 }
  0x84   :  { %v59_v6 = vpop.f32.mrf.mxu0 }
  0x85   :  { %v79_v7 = vpop.f32.mrf.mxu1  ;;  %v60_v8 = vadd.f32 %v59_v6, %v36_v5 }
  0x86   :  { %v80_v9 = vadd.f32 %v79_v7, %v36_v5 }
  0x87   :  { %82 = vst [vmem:[#allocation5] sm:$0xff] %v60_v8 }
  0x88   :  { %83 = vst [vmem:[#allocation5 + $0x8] sm:$0xff] %v80_v9 }
  0x89   :  { %94 = dma.vmem_to_hbm [thread:$0]  %s90_s21, 256, %s92_s24, [#allocation4]  }
  0x8a   :  { %157 = dma.done.wait [#allocation4], 256  }
  0x8b   :  { %158 = vsyncadd [#allocation4], 4294967040 }
  0x8c   :  { %99 = vsyncpa [#allocation3], 1 }
  0x8d   :  { %100 = vsyncpa [#allocation4], 1 }

</bundles_post_ra>
